<compile_context>
chip_gen: v7x
topology: tpu7x:2x2x1
jax: 0.10.0
libtpu: 0.0.40
codegen_flags: <defaults>
</compile_context>

<pallas_src>
import functools

import jax
import jax.numpy as jnp
from jax import lax
from jax.experimental import pallas as pl
from jax.experimental.pallas import tpu as pltpu

_LANES = 128
_I32_BIG = 2**31 - 1                 # Python int -> jaxpr literal (never a captured array)
_BLOCK_BYTES = 4 * 1024 * 1024       # ~4 MiB input blocks (double-buffered)
_FLAT_ROWS = 4096                    # (4096, 128) f32 = 2 MiB per flat block
_GROUPS_PER_BLOCK = 8                # last-dim blocks cover up to 8*128 = 1024 columns
_VMEM_LIMIT = 32 * 1024 * 1024       # explicit scoped-VMEM request (safe on v5e/v6e/v7x)

_NATIVE16 = None


def _prod(shape):
    r = 1
    for s in shape:
        r *= int(s)
    return r


def _bf16_native():
    """True on chips with a native bf16 VPU path (v6e / v7x)."""
    global _NATIVE16
    if _NATIVE16 is None:
        try:
            kind = jax.devices()[0].device_kind.lower()
            _NATIVE16 = not any(t in kind for t in ("v2", "v3", "v4", "v5"))
        except Exception:
            _NATIVE16 = False
    return _NATIVE16


def _acc_dtype(dtype):
    # Compare/accumulate dtype.  bf16 stays bf16 on v6e/v7x (exact compares,
    # half the VPU work / accumulator footprint); f32 elsewhere; i32 for ints.
    if dtype == jnp.bfloat16 and _bf16_native():
        return jnp.bfloat16
    if jnp.issubdtype(dtype, jnp.floating):
        return jnp.float32
    return jnp.int32


def _acc_fill(acc_dtype):
    # Identity element for max, as a Python scalar literal.
    if jnp.issubdtype(acc_dtype, jnp.floating):
        return float("-inf")
    return int(jnp.iinfo(jnp.int32).min)


def _pad_fill(dtype):
    # Smallest representable value of the *input* dtype (rare host-side tail pad).
    if jnp.issubdtype(dtype, jnp.floating):
        return float("-inf")
    return int(jnp.iinfo(dtype).min)


# ------------------------------- kernels ----------------------------------- #
def _argmax_flat_kernel(x_ref, oidx_ref, omax_ref, vmax_ref, vstep_ref, *,
                        tr, total_blocks, blocks_per_core, valid_rows_last,
                        fill, acc_dtype):
    """dim=None: elementwise running (max, block-id) accumulator; reductions at finalize."""
    c = pl.program_id(0)                  # core split (parallel)
    i = pl.program_id(1)                  # blocks within this core (arbitrary)
    gb = c * blocks_per_core + i          # global block id

    @pl.when(i == 0)
    def _init():
        vmax_ref[...] = jnp.full(vmax_ref.shape, fill, acc_dtype)
        vstep_ref[...] = jnp.zeros(vstep_ref.shape, jnp.int32)

    def _fold(mask_rows):
        xb = x_ref[...].astype(acc_dtype)                       # (tr, 128)
        if mask_rows is not None:                               # ragged last block only
            r = lax.broadcasted_iota(jnp.int32, xb.shape, 0)
            xb = jnp.where(r < mask_rows, xb, fill)
        better = xb > vmax_ref[...]                             # strict > keeps first occurrence
        vstep_ref[...] = jnp.where(better, gb, vstep_ref[...])
        vmax_ref[...] = jnp.where(better, xb, vmax_ref[...])

    @pl.when(gb < total_blocks - 1)
    def _body():
        _fold(None)

    @pl.when(gb == total_blocks - 1)
    def _last():
        _fold(valid_rows_last if valid_rows_last != tr else None)
    # gb > total_blocks - 1 (only when total_blocks is odd): dead step, no fold.

    @pl.when(i == blocks_per_core - 1)
    def _finalize():
        v = vmax_ref[...]
        bm = jnp.max(jnp.max(v, axis=1, keepdims=True), axis=0, keepdims=True)   # (1, 1)
        r = lax.broadcasted_iota(jnp.int32, v.shape, 0)
        lane = lax.broadcasted_iota(jnp.int32, v.shape, 1)
        flat = vstep_ref[...] * (tr * _LANES) + r * _LANES + lane
        cand = jnp.where(v == bm, flat, _I32_BIG)
        bi = jnp.min(jnp.min(cand, axis=1, keepdims=True), axis=0, keepdims=True)
        oidx_ref[...] = jnp.broadcast_to(bi, oidx_ref.shape)
        omax_ref[...] = jnp.broadcast_to(bm, omax_ref.shape).astype(omax_ref.dtype)


def _argmax_lastdim_kernel(x_ref, o_ref, vmax_ref, vcol_ref, *,
                           gpb, num_l_blocks, full_folds, last_folds,
                           fill, acc_dtype):
    """Per-row argmax over the last axis: lane-dense (tm, <=128) running accumulators."""
    lk = pl.program_id(1)
    acc_w = vmax_ref.shape[1]

    @pl.when(lk == 0)
    def _init():
        vmax_ref[...] = jnp.full(vmax_ref.shape, fill, acc_dtype)
        vcol_ref[...] = jnp.zeros(vcol_ref.shape, jnp.int32)

    def _fold(j, g, width):
        if width == acc_w:
            v = x_ref[:, pl.ds(j * _LANES, width)].astype(acc_dtype)
            better = v > vmax_ref[...]
            vcol_ref[...] = jnp.where(better, g, vcol_ref[...])
            vmax_ref[...] = jnp.where(better, v, vmax_ref[...])
        else:
            # Partial (ragged) final lane group: columns map to acc lanes [0, width).
            v = x_ref[:, pl.ds(j * _LANES, width)].astype(acc_dtype)
            cur = vmax_ref[:, pl.ds(0, width)]
            better = v > cur
            vcol_ref[:, pl.ds(0, width)] = jnp.where(
                better, g, vcol_ref[:, pl.ds(0, width)])
            vmax_ref[:, pl.ds(0, width)] = jnp.where(better, v, cur)

    uniform = (num_l_blocks > 1
               and len(last_folds) == full_folds
               and all(w == acc_w for _, w in last_folds))

    if num_l_blocks == 1:
        for j, w in last_folds:
            _fold(j, j, w)
    elif uniform:
        for j in range(full_folds):
            _fold(j, lk * gpb + j, acc_w)
    else:
        last = num_l_blocks - 1

        @pl.when(lk < last)
        def _main():
            for j in range(full_folds):
                _fold(j, lk * gpb + j, acc_w)

        @pl.when(lk == last)
        def _tail():
            for j, w in last_folds:
                _fold(j, last * gpb + j, w)

    @pl.when(lk == num_l_blocks - 1)
    def _finalize():
        v = vmax_ref[...]
        bm = jnp.max(v, axis=1, keepdims=True)                  # (tm, 1)
        lane = lax.broadcasted_iota(jnp.int32, v.shape, 1)
        col = vcol_ref[...] * _LANES + lane                     # global column index
        cand = jnp.where(v == bm, col, _I32_BIG)                # first-occurrence ties
        o_ref[...] = jnp.min(cand, axis=1, keepdims=True)


def _argmax_middle_kernel(x_ref, o_ref, vmax_ref, *,
                          tl_red, num_c_blocks, rem_folds, fill, acc_dtype):
    """Argmax over a non-last axis, no transpose: reduced axis blocked by tl_red.

    The running index lives directly in o_ref (its block index is constant
    across the reduction grid axis, so it stays VMEM-resident).
    """
    ci = pl.program_id(2)

    @pl.when(ci == 0)
    def _init():
        vmax_ref[...] = jnp.full(vmax_ref.shape, fill, acc_dtype)
        o_ref[...] = jnp.zeros(o_ref.shape, jnp.int32)

    def _fold(j):
        v = x_ref[:, j, :].astype(acc_dtype)                    # (tp, ts)
        better = v > vmax_ref[...]                              # strict > -> first occurrence
        o_ref[...] = jnp.where(better, ci * tl_red + j, o_ref[...])
        vmax_ref[...] = jnp.where(better, v, vmax_ref[...])

    if rem_folds == tl_red:
        for j in range(tl_red):
            _fold(j)
    else:
        @pl.when(ci < num_c_blocks - 1)
        def _main():
            for j in range(tl_red):
                _fold(j)

        @pl.when(ci == num_c_blocks - 1)
        def _tail():
            for j in range(rem_folds):
                _fold(j)


# ------------------------------- wrappers ----------------------------------- #
def _argmax_flat(x):
    n = x.size
    acc_dtype = _acc_dtype(x.dtype)
    fill = _acc_fill(acc_dtype)

    flat = x.reshape(-1)
    pad = (-n) % _LANES
    if pad:
        # Only hit when numel % 128 != 0 (pads <= 127 elements).
        flat = jnp.pad(flat, (0, pad), constant_values=_pad_fill(x.dtype))
    x2d = flat.reshape(-1, _LANES)
    n_rows = x2d.shape[0]

    tr = n_rows if n_rows <= _FLAT_ROWS else _FLAT_ROWS          # full dim or multiple of 8
    total_blocks = pl.cdiv(n_rows, tr)
    bpc = pl.cdiv(total_blocks, 2)                               # blocks per "core" split
    valid_rows_last = n_rows - (total_blocks - 1) * tr

    kernel = functools.partial(
        _argmax_flat_kernel, tr=tr, total_blocks=total_blocks,
        blocks_per_core=bpc, valid_rows_last=valid_rows_last,
        fill=fill, acc_dtype=acc_dtype)

    oidx, omax = pl.pallas_call(
        kernel,
        out_shape=(jax.ShapeDtypeStruct((16, _LANES), jnp.int32),
                   jax.ShapeDtypeStruct((16, _LANES), acc_dtype)),
        grid_spec=pltpu.PrefetchScalarGridSpec(
            num_scalar_prefetch=0,
            grid=(2, bpc),
            in_specs=[pl.BlockSpec(
                (tr, _LANES),
                lambda c, i: (jnp.minimum(c * bpc + i, total_blocks - 1), 0))],
            out_specs=[pl.BlockSpec((8, _LANES), lambda c, i: (c, 0)),
                       pl.BlockSpec((8, _LANES), lambda c, i: (c, 0))],
            scratch_shapes=[pltpu.VMEM((tr, _LANES), acc_dtype),
                            pltpu.VMEM((tr, _LANES), jnp.int32)],
        ),
        compiler_params=pltpu.CompilerParams(
            dimension_semantics=("parallel", "arbitrary"),
            vmem_limit_bytes=_VMEM_LIMIT),
    )(x2d)

    # Combine the two partial (max, idx) results; core 0 owns earlier flat
    # indices, so strict > keeps first-occurrence tie-breaking.
    m0, m1 = omax[0, 0], omax[8, 0]
    i0, i1 = oidx[0, 0], oidx[8, 0]
    return jnp.where(m1 > m0, i1, i0)


def _argmax_lastdim(x2d):
    p, l = x2d.shape
    acc_dtype = _acc_dtype(x2d.dtype)
    fill = _acc_fill(acc_dtype)
    itemsize = x2d.dtype.itemsize

    n_groups = pl.cdiv(l, _LANES)
    gpb = min(n_groups, _GROUPS_PER_BLOCK)
    tl = gpb * _LANES
    if tl > l:
        tl = l                                                   # full-dim block (always legal)
    num_l_blocks = pl.cdiv(l, tl)

    # Static per-block fold plans.
    full_folds = tl // _LANES if tl % _LANES == 0 else 1
    base = (num_l_blocks - 1) * tl
    last_folds = []
    off = 0
    while base + off < l:
        last_folds.append((off // _LANES, min(_LANES, l - (base + off))))
        off += _LANES

    acc_w = _LANES if l > _LANES else l

    tm = _BLOCK_BYTES // max(1, tl * itemsize)
    tm = max(8, min(tm, 2048))
    tm -= tm % 8
    if p <= tm:
        tm = p                                                   # full dim -> legal block

    grid = (pl.cdiv(p, tm), num_l_blocks)                        # reduction axis last

    kernel = functools.partial(
        _argmax_lastdim_kernel, gpb=max(1, tl // _LANES),
        num_l_blocks=num_l_blocks, full_folds=full_folds, last_folds=last_folds,
        fill=fill, acc_dtype=acc_dtype)

    out = pl.pallas_call(
        kernel,
        out_shape=jax.ShapeDtypeStruct((p, 1), jnp.int32),
        grid_spec=pltpu.PrefetchScalarGridSpec(
            num_scalar_prefetch=0,
            grid=grid,
            in_specs=[pl.BlockSpec((tm, tl), lambda i, k: (i, k))],
            out_specs=pl.BlockSpec((tm, 1), lambda i, k: (i, 0)),
            scratch_shapes=[pltpu.VMEM((tm, acc_w), acc_dtype),
                            pltpu.VMEM((tm, acc_w), jnp.int32)],
        ),
        compiler_params=pltpu.CompilerParams(
            dimension_semantics=("parallel", "arbitrary"),
            vmem_limit_bytes=_VMEM_LIMIT),
    )(x2d)
    # TODO(synk): for tiny l a lane-dense (1, p) output layout would avoid
    # masked 1-lane stores; negligible for the common large-l case.
    return out[:, 0]


def _argmax_middle(x3d):
    p, l, s = x3d.shape
    acc_dtype = _acc_dtype(x3d.dtype)
    fill = _acc_fill(acc_dtype)
    itemsize = x3d.dtype.itemsize

    tl_red = l if l <= 8 else 8                                  # reduce-axis block (8 | == l)
    min_tp = p if p < 8 else 8
    ts_budget = max(_LANES, _BLOCK_BYTES // max(1, tl_red * min_tp * itemsize))
    if s <= ts_budget:
        ts = s                                                   # full dim
    else:
        ts = (ts_budget // _LANES) * _LANES                      # multiple of 128
    tp_budget = max(1, _BLOCK_BYTES // max(1, tl_red * ts * itemsize))
    if p <= tp_budget:
        tp = p                                                   # full dim
    else:
        tp = max(8, tp_budget - tp_budget % 8)                   # multiple of 8

    num_c_blocks = pl.cdiv(l, tl_red)
    rem_folds = l - (num_c_blocks - 1) * tl_red
    grid = (pl.cdiv(p, tp), pl.cdiv(s, ts), num_c_blocks)        # reduced axis last

    kernel = functools.partial(
        _argmax_middle_kernel, tl_red=tl_red, num_c_blocks=num_c_blocks,
        rem_folds=rem_folds, fill=fill, acc_dtype=acc_dtype)

    out = pl.pallas_call(
        kernel,
        out_shape=jax.ShapeDtypeStruct((p, s), jnp.int32),
        grid_spec=pltpu.PrefetchScalarGridSpec(
            num_scalar_prefetch=0,
            grid=grid,
            in_specs=[pl.BlockSpec((tp, tl_red, ts), lambda pi, si, ci: (pi, ci, si))],
            out_specs=pl.BlockSpec((tp, ts), lambda pi, si, ci: (pi, si)),
            scratch_shapes=[pltpu.VMEM((tp, ts), acc_dtype)],
        ),
        compiler_params=pltpu.CompilerParams(
            dimension_semantics=("parallel", "parallel", "arbitrary"),
            vmem_limit_bytes=_VMEM_LIMIT),
    )(x3d)
    return out


def argmax(x, dim=None):
    """Pallas TPU equivalent of torch.argmax(x, dim).  Returns int32 indices."""
    x = jnp.asarray(x)
    if x.dtype == jnp.bool_:
        x = x.astype(jnp.int32)
    if x.size == 0:
        raise ValueError("argmax of an empty tensor is not defined")
    if x.size >= 2**31:
        raise ValueError("argmax kernels return int32 indices; input has >= 2^31 elements")

    if dim is None:
        return _argmax_flat(x)

    dim = dim % x.ndim
    out_dims = x.shape[:dim] + x.shape[dim + 1:]
    p = _prod(x.shape[:dim])
    l = int(x.shape[dim])
    s = _prod(x.shape[dim + 1:])

    if s == 1:
        # Reduced axis is (effectively) the last one: lane-axis reduction.
        res = _argmax_lastdim(x.reshape(p, l))
    else:
        # Reduced axis in the middle (e.g. channels of NCHW): no transpose,
        # lane-dense blocks/outputs, running accumulator over the reduced axis.
        res = _argmax_middle(x.reshape(p, l, s))

    return res.reshape(out_dims)


class ArgMax:
    """Mirrors the PyTorch ArgMax module (no parameters)."""

    def __init__(self, dim: int | None = None):
        self.dim = dim

    def __call__(self, x):
        return argmax(x, self.dim)


if __name__ == "__main__":
    key = jax.random.PRNGKey(0)
    k1, k2, k3 = jax.random.split(key, 3)

    x = jax.random.normal(k1, (2, 4, 16, 16), dtype=jnp.float32)

    # dim=None (module default): scalar index into the flattened tensor.
    out_none = jax.block_until_ready(ArgMax(dim=None)(x))
    ref_none = jnp.argmax(x)
    assert int(out_none) == int(ref_none), (int(out_none), int(ref_none))

    # dim=1 (channel axis of NCHW) -> middle-axis kernel, no transpose.
    out_d1 = jax.block_until_ready(ArgMax(dim=1)(x))
    ref_d1 = jnp.argmax(x, axis=1).astype(jnp.int32)
    assert out_d1.shape == ref_d1.shape and bool(jnp.array_equal(out_d1, ref_d1))

    # dim=0 -> middle-axis kernel.
    out_d0 = jax.block_until_ready(ArgMax(dim=0)(x))
    ref_d0 = jnp.argmax(x, axis=0).astype(jnp.int32)
    assert out_d0.shape == ref_d0.shape and bool(jnp.array_equal(out_d0, ref_d0))

    # dim=-1 (last axis) -> lane-reduction kernel (l < 128, partial lane group).
    out_dl = jax.block_until_ready(ArgMax(dim=-1)(x))
    ref_dl = jnp.argmax(x, axis=-1).astype(jnp.int32)
    assert out_dl.shape == ref_dl.shape and bool(jnp.array_equal(out_dl, ref_dl))

    # Larger dim=None input: exercises the two-way split / running accumulator.
    xb = jax.random.normal(k2, (8, 8, 64, 65), dtype=jnp.float32)
    out_big = jax.block_until_ready(ArgMax(dim=None)(xb))
    ref_big = jnp.argmax(xb)
    assert int(out_big) == int(ref_big), (int(out_big), int(ref_big))

    # Last-dim argmax with L > 1024 and a ragged final L block.
    xl = jax.random.normal(k3, (4, 1536), dtype=jnp.float32)
    out_l = jax.block_until_ready(ArgMax(dim=-1)(xl))
    ref_l = jnp.argmax(xl, axis=-1).astype(jnp.int32)
    assert out_l.shape == ref_l.shape and bool(jnp.array_equal(out_l, ref_l))

    # bf16 last-dim (native bf16 compare path on v6e/v7x, f32 fallback elsewhere).
    xh = jax.random.normal(k3, (16, 384), dtype=jnp.bfloat16)
    out_h = jax.block_until_ready(ArgMax(dim=-1)(xh))
    ref_h = jnp.argmax(xh, axis=-1).astype(jnp.int32)
    assert out_h.shape == ref_h.shape and bool(jnp.array_equal(out_h, ref_h))

    print("KERNEL_OK")
</pallas_src>

<mosaic_0001>
module attributes {stable_mosaic.version = 11 : i64} {
  func.func @_argmax_flat_kernel(%arg0: i32, %arg1: i32, %arg2: memref<16x128xf32, #tpu.memory_space<vmem>>, %arg3: memref<8x128xi32, #tpu.memory_space<vmem>>, %arg4: memref<8x128xf32, #tpu.memory_space<vmem>>, %arg5: memref<16x128xf32, #tpu.memory_space<vmem>>, %arg6: memref<16x128xi32, #tpu.memory_space<vmem>>) attributes {dimension_semantics = [#tpu.dimension_semantics<parallel>, #tpu.dimension_semantics<arbitrary>], iteration_bounds = array<i64: 2, 1>, scalar_prefetch = 0 : i64, scratch_operands = 2 : i64, tpu.core_type = #tpu.core_type<tc>, window_params = [{transform_indices = @transform_0, window_bounds = array<i64: 16, 128>}, {transform_indices = @transform_1, window_bounds = array<i64: 8, 128>}, {transform_indices = @transform_2, window_bounds = array<i64: 8, 128>}]} {
    %c1_i32 = arith.constant 1 : i32
    %0 = arith.muli %arg0, %c1_i32 : i32
    %1 = arith.addi %0, %arg1 : i32
    %c0_i32 = arith.constant 0 : i32
    %2 = arith.cmpi eq, %arg1, %c0_i32 : i32
    %3 = arith.extui %2 : i1 to i32
    %c0_i32_0 = arith.constant 0 : i32
    %4 = arith.cmpi ne, %3, %c0_i32_0 : i32
    scf.if %4 {
      %cst = arith.constant 0xFF800000 : f32
      %14 = vector.broadcast %cst : f32 to vector<16x128xf32>
      %c0 = arith.constant 0 : index
      %c0_7 = arith.constant 0 : index
      %15 = vector.load %arg5[%c0, %c0_7] : memref<16x128xf32, #tpu.memory_space<vmem>>, vector<16x128xf32>
      tpu.vector_store %arg5[%c0, %c0_7], %14 {strides = array<i32>} : memref<16x128xf32, #tpu.memory_space<vmem>>, vector<16x128xf32>,
      %c0_i32_8 = arith.constant 0 : i32
      %16 = vector.broadcast %c0_i32_8 : i32 to vector<16x128xi32>
      %c0_9 = arith.constant 0 : index
      %c0_10 = arith.constant 0 : index
      %17 = vector.load %arg6[%c0_9, %c0_10] : memref<16x128xi32, #tpu.memory_space<vmem>>, vector<16x128xi32>
      tpu.vector_store %arg6[%c0_9, %c0_10], %16 {strides = array<i32>} : memref<16x128xi32, #tpu.memory_space<vmem>>, vector<16x128xi32>,
    } else {
    }
    %c0_i32_1 = arith.constant 0 : i32
    %5 = arith.cmpi slt, %1, %c0_i32_1 : i32
    %6 = arith.extui %5 : i1 to i32
    %c0_i32_2 = arith.constant 0 : i32
    %7 = arith.cmpi ne, %6, %c0_i32_2 : i32
    scf.if %7 {
      %c0 = arith.constant 0 : index
      %c0_7 = arith.constant 0 : index
      %14 = vector.load %arg2[%c0, %c0_7] : memref<16x128xf32, #tpu.memory_space<vmem>>, vector<16x128xf32>
      %c0_8 = arith.constant 0 : index
      %c0_9 = arith.constant 0 : index
      %15 = vector.load %arg5[%c0_8, %c0_9] : memref<16x128xf32, #tpu.memory_space<vmem>>, vector<16x128xf32>
      %16 = arith.cmpf ogt, %14, %15 : vector<16x128xf32>
      %c0_10 = arith.constant 0 : index
      %c0_11 = arith.constant 0 : index
      %17 = vector.load %arg6[%c0_10, %c0_11] : memref<16x128xi32, #tpu.memory_space<vmem>>, vector<16x128xi32>
      %18 = vector.broadcast %1 : i32 to vector<16x128xi32>
      %19 = arith.select %16, %18, %17 : vector<16x128xi1>, vector<16x128xi32>
      %c0_12 = arith.constant 0 : index
      %c0_13 = arith.constant 0 : index
      %20 = vector.load %arg6[%c0_12, %c0_13] : memref<16x128xi32, #tpu.memory_space<vmem>>, vector<16x128xi32>
      tpu.vector_store %arg6[%c0_12, %c0_13], %19 {strides = array<i32>} : memref<16x128xi32, #tpu.memory_space<vmem>>, vector<16x128xi32>,
      %c0_14 = arith.constant 0 : index
      %c0_15 = arith.constant 0 : index
      %21 = vector.load %arg5[%c0_14, %c0_15] : memref<16x128xf32, #tpu.memory_space<vmem>>, vector<16x128xf32>
      %22 = arith.select %16, %14, %21 : vector<16x128xi1>, vector<16x128xf32>
      %c0_16 = arith.constant 0 : index
      %c0_17 = arith.constant 0 : index
      %23 = vector.load %arg5[%c0_16, %c0_17] : memref<16x128xf32, #tpu.memory_space<vmem>>, vector<16x128xf32>
      tpu.vector_store %arg5[%c0_16, %c0_17], %22 {strides = array<i32>} : memref<16x128xf32, #tpu.memory_space<vmem>>, vector<16x128xf32>,
    } else {
    }
    %c0_i32_3 = arith.constant 0 : i32
    %8 = arith.cmpi eq, %1, %c0_i32_3 : i32
    %9 = arith.extui %8 : i1 to i32
    %c0_i32_4 = arith.constant 0 : i32
    %10 = arith.cmpi ne, %9, %c0_i32_4 : i32
    scf.if %10 {
      %c0 = arith.constant 0 : index
      %c0_7 = arith.constant 0 : index
      %14 = vector.load %arg2[%c0, %c0_7] : memref<16x128xf32, #tpu.memory_space<vmem>>, vector<16x128xf32>
      %c0_8 = arith.constant 0 : index
      %c0_9 = arith.constant 0 : index
      %15 = vector.load %arg5[%c0_8, %c0_9] : memref<16x128xf32, #tpu.memory_space<vmem>>, vector<16x128xf32>
      %16 = arith.cmpf ogt, %14, %15 : vector<16x128xf32>
      %c0_10 = arith.constant 0 : index
      %c0_11 = arith.constant 0 : index
      %17 = vector.load %arg6[%c0_10, %c0_11] : memref<16x128xi32, #tpu.memory_space<vmem>>, vector<16x128xi32>
      %18 = vector.broadcast %1 : i32 to vector<16x128xi32>
      %19 = arith.select %16, %18, %17 : vector<16x128xi1>, vector<16x128xi32>
      %c0_12 = arith.constant 0 : index
      %c0_13 = arith.constant 0 : index
      %20 = vector.load %arg6[%c0_12, %c0_13] : memref<16x128xi32, #tpu.memory_space<vmem>>, vector<16x128xi32>
      tpu.vector_store %arg6[%c0_12, %c0_13], %19 {strides = array<i32>} : memref<16x128xi32, #tpu.memory_space<vmem>>, vector<16x128xi32>,
      %c0_14 = arith.constant 0 : index
      %c0_15 = arith.constant 0 : index
      %21 = vector.load %arg5[%c0_14, %c0_15] : memref<16x128xf32, #tpu.memory_space<vmem>>, vector<16x128xf32>
      %22 = arith.select %16, %14, %21 : vector<16x128xi1>, vector<16x128xf32>
      %c0_16 = arith.constant 0 : index
      %c0_17 = arith.constant 0 : index
      %23 = vector.load %arg5[%c0_16, %c0_17] : memref<16x128xf32, #tpu.memory_space<vmem>>, vector<16x128xf32>
      tpu.vector_store %arg5[%c0_16, %c0_17], %22 {strides = array<i32>} : memref<16x128xf32, #tpu.memory_space<vmem>>, vector<16x128xf32>,
    } else {
    }
    %c0_i32_5 = arith.constant 0 : i32
    %11 = arith.cmpi eq, %arg1, %c0_i32_5 : i32
    %12 = arith.extui %11 : i1 to i32
    %c0_i32_6 = arith.constant 0 : i32
    %13 = arith.cmpi ne, %12, %c0_i32_6 : i32
    scf.if %13 {
      %c0 = arith.constant 0 : index
      %c0_7 = arith.constant 0 : index
      %14 = vector.load %arg5[%c0, %c0_7] : memref<16x128xf32, #tpu.memory_space<vmem>>, vector<16x128xf32>
      %cst = arith.constant dense<0xFF800000> : vector<16xf32>
      %15 = vector.multi_reduction <maximumf>, %14, %cst [1] : vector<16x128xf32> to vector<16xf32>
      %16 = vector.shape_cast %15 : vector<16xf32> to vector<16x1xf32>
      %cst_8 = arith.constant dense<0xFF800000> : vector<1xf32>
      %17 = vector.multi_reduction <maximumf>, %16, %cst_8 [0] : vector<16x1xf32> to vector<1xf32>
      %18 = vector.shape_cast %17 : vector<1xf32> to vector<1x1xf32>
      %19 = tpu.iota {dimensions = array<i32: 0>} : vector<16x128xi32>
      %20 = tpu.iota {dimensions = array<i32: 1>} : vector<16x128xi32>
      %c0_9 = arith.constant 0 : index
      %c0_10 = arith.constant 0 : index
      %21 = vector.load %arg6[%c0_9, %c0_10] : memref<16x128xi32, #tpu.memory_space<vmem>>, vector<16x128xi32>
      %c2048_i32 = arith.constant 2048 : i32
      %22 = vector.broadcast %c2048_i32 : i32 to vector<16x128xi32>
      %23 = arith.muli %21, %22 : vector<16x128xi32>
      %c128_i32 = arith.constant 128 : i32
      %24 = vector.broadcast %c128_i32 : i32 to vector<16x128xi32>
      %25 = arith.muli %19, %24 : vector<16x128xi32>
      %26 = arith.addi %23, %25 : vector<16x128xi32>
      %27 = arith.addi %26, %20 : vector<16x128xi32>
      %28 = vector.broadcast %18 : vector<1x1xf32> to vector<16x128xf32>
      %29 = arith.cmpf oeq, %14, %28 : vector<16x128xf32>
      %c2147483647_i32 = arith.constant 2147483647 : i32
      %30 = vector.broadcast %c2147483647_i32 : i32 to vector<16x128xi32>
      %31 = arith.select %29, %27, %30 : vector<16x128xi1>, vector<16x128xi32>
      %cst_11 = arith.constant dense<2147483647> : vector<16xi32>
      %32 = vector.multi_reduction <minsi>, %31, %cst_11 [1] : vector<16x128xi32> to vector<16xi32>
      %33 = vector.shape_cast %32 : vector<16xi32> to vector<16x1xi32>
      %cst_12 = arith.constant dense<2147483647> : vector<1xi32>
      %34 = vector.multi_reduction <minsi>, %33, %cst_12 [0] : vector<16x1xi32> to vector<1xi32>
      %35 = vector.shape_cast %34 : vector<1xi32> to vector<1x1xi32>
      %36 = vector.shape_cast %35 : vector<1x1xi32> to vector<1x1xi32>
      %37 = vector.broadcast %36 : vector<1x1xi32> to vector<8x128xi32>
      %c0_13 = arith.constant 0 : index
      %c0_14 = arith.constant 0 : index
      %38 = vector.load %arg3[%c0_13, %c0_14] : memref<8x128xi32, #tpu.memory_space<vmem>>, vector<8x128xi32>
      tpu.vector_store %arg3[%c0_13, %c0_14], %37 {strides = array<i32>} : memref<8x128xi32, #tpu.memory_space<vmem>>, vector<8x128xi32>,
      %39 = vector.shape_cast %18 : vector<1x1xf32> to vector<1x1xf32>
      %40 = vector.broadcast %39 : vector<1x1xf32> to vector<8x128xf32>
      %c0_15 = arith.constant 0 : index
      %c0_16 = arith.constant 0 : index
      %41 = vector.load %arg4[%c0_15, %c0_16] : memref<8x128xf32, #tpu.memory_space<vmem>>, vector<8x128xf32>
      tpu.vector_store %arg4[%c0_15, %c0_16], %40 {strides = array<i32>} : memref<8x128xf32, #tpu.memory_space<vmem>>, vector<8x128xf32>,
    } else {
    }
    return
  }
  func.func @transform_0(%arg0: i32, %arg1: i32) -> (i32, i32) {
    %c1_i32 = arith.constant 1 : i32
    %0 = arith.muli %arg0, %c1_i32 : i32
    %1 = arith.addi %0, %arg1 : i32
    %c0_i32 = arith.constant 0 : i32
    %2 = arith.minsi %1, %c0_i32 : i32
    %c0_i32_0 = arith.constant 0 : i32
    %c0_i32_1 = arith.constant 0 : i32
    return %2, %c0_i32_0 : i32, i32
  }
  func.func @transform_1(%arg0: i32, %arg1: i32) -> (i32, i32) {
    %c0_i32 = arith.constant 0 : i32
    %c0_i32_0 = arith.constant 0 : i32
    return %arg0, %c0_i32 : i32, i32
  }
  func.func @transform_2(%arg0: i32, %arg1: i32) -> (i32, i32) {
    %c0_i32 = arith.constant 0 : i32
    %c0_i32_0 = arith.constant 0 : i32
    return %arg0, %c0_i32 : i32, i32
  }
}

</mosaic_0001>

<bundles_post_ra>
// kernel: tpu_custom_call.1
= control target key start
LH: loop header
LB: loop body
LE: loop exit
PB: predicated region body
PF: predicated region fallthrough
CT: control target
= control target key end

     0   :  { %8 = vsyncpa [#allocation5], 0  ;;  %s985_s0 = inlined_call_operand.hbm [shape: f32[16,128], index: 0, kind: input, shape index: {}]   ;;  %s986_s1 = inlined_call_operand.hbm [shape: s32[16,128], index: 1, kind: output, shape index: {0}]   ;;  %s987_s2 = inlined_call_operand.hbm [shape: f32[16,128], index: 2, kind: output, shape index: {1}]  }
   0x1   :  { %10 = vsyncpa [#allocation5 + $0x1], 0 }
   0x2   :  { %11 = vsyncpa [#allocation6], 0 }
   0x3   :  { %13 = vsyncpa [#allocation6 + $0x1], 0 }
   0x4   :  { %14 = vsyncpa [#allocation9], 0 }
   0x5   :  { %16 = vsyncpa [#allocation9 + $0x1], 0  ;;  %s775_s9 = smov 0   ;;  %s777_s10 = smov 0  }
   0x6   :  { %s779_s11 = smov 0   ;;  %s781_s12 = smov 0  }
   0x7   :  { %s783_s13 = smov 0   ;;  %s785_s14 = smov 0  }
   0x8   :  { %s787_s15 = smov 0   ;;  %s789_s16 = smov 0  }
   0x9 LB: > { %s471_s17 = sadd.s32 4294967295, %s751_s16   ;;  %s472_s18 = sadd.s32 4294967294, %s751_s16   ;;  %s751_s16 = sphi %s789_s16, %s22_s16   ;;  %s747_s15 = sphi %s787_s15, %s1006_s15   ;;  %s743_s14 = sphi %s785_s14, %s1005_s14   ;;  %s739_s13 = sphi %s783_s13, %s975_s13   ;;  %s735_s12 = sphi %s781_s12, %s1004_s12   ;;  %s731_s11 = sphi %s779_s11, %s1003_s11   ;;  %s727_s10 = sphi %s777_s10, %s1002_s10   ;;  %s723_s9 = sphi %s775_s9, %s1001_s9  }
   0xa   : > { %s34_s19 = sadd.s32 1, %s747_s15  ;;  %p720_p1 = scmp.ne.s32.totalorder %s739_s13, 0 }
   0xb   : > { %p36_p0 = scmp.ge.s32.totalorder %s34_s19, 2  ;;  %p55_p2 = scmp.eq.s32.totalorder %s751_s16, 0 }
   0xc   : > { %p60_p3 = scmp.ne.s32.totalorder %s739_s13, %s735_s12  ;;  %p61_p5 = scmp.eq.s32.totalorder %s471_s17, 0 }
   0xd   : > { %s1008_s19 = smov (%p36_p0, %s34_s19), 0  ;;  %p821_p4 = por %p720_p1, %p55_p2 }
   0xe   : > { %p825_p6 = por %p61_p5, %p60_p3  ;;  %s70_s22 = ssub.s32 %s747_s15, %s1008_s19 }
   0xf   : > { %p71_p7 = scmp.eq.s32.totalorder %s70_s22, 0  ;;  %s73_s23 = sadd.s32 1, %s731_s11 }
  0x10   : > { %s992_s21 = scalar_select %p825_p6, 1, 0 }
  0x11   : > { %s833_s24 = scalar_select %p71_p7, %s731_s11, %s73_s23  }
  0x12   : > { %p83_p8 = scmp.ne.s32.totalorder %s731_s11, %s727_s10  ;;  %p84_p9 = scmp.eq.s32.totalorder %s471_s17, 1 }
  0x13   : > { %p89_p10 = scmp.ne.s32.totalorder %s727_s10, %s723_s9  ;;  %p90_p11 = scmp.eq.s32.totalorder %s472_s18, 1 }
  0x14   : > { %p839_p12 = por %p84_p9, %p83_p8  ;;  %p508_p1 = scmp.lt.s32.totalorder %s751_s16, 2 }
  0x15   : > { %p844_p0 = por %p90_p11, %p89_p10  ;;  %s753_s27 = smov [#allocation4]  }
  0x16   : > { %s993_s25 = scalar_select %p839_p12, 1, 0 }
  0x17   : > { %s994_s26 = scalar_select %p844_p0, 1, 0 }
  0x18   : > { %s150_s28 = sshll.u32 %s753_s27, 4  ;;  %p851_p2 = pnand %p508_p1, %p821_p4  ;;  %s151_s28 = int_to_ptr.vmem [resolvable:$true] %s150_s28 }
  0x19   : > { %s586_s4 = scalar_lea.hbm %s985_s0, 256 }
  0x1a   : > { %s995_s29 = scalar_select %p851_p2, 1, 0 }
  0x1b   : > { %p587_p3 = scmp.ne.s32.totalorder %s985_s0, %s586_s4  ;;  %p588_p5 = pneg %p851_p2 }
  0x1c   : > { %p593_p9 = scmp.lt.u32.totalorder %s586_s4, %s586_s4  ;;  %p595_p4 = scmp.lt.u32.totalorder %s586_s4, %s985_s0 }
  0x1d   : > { %p589_p7 = pnand %p588_p5, %p587_p3 }
  0x1e   : > { %p596_p10 = por %p595_p4, %p593_p9 }
  0x1f   : > { %p590_p8 = pneg %p589_p7 }
  0x21   : > { %p597_p11 = pnand %p596_p10, %p590_p8 }
  0x23   : > { %600 = shalt.err (!%p597_p11)
}
  0x24   : > { %s601_s12 = scalar_lea.vmem %s151_s28, 256  ;;  %s608_s17 = scalar_lea.vmem %s151_s28, 512 }
  0x25   : > { %p602_p1 = scmp.ne.s32.totalorder %s151_s28, %s601_s12  ;;  %p609_p12 = scmp.lt.s32.totalorder %s151_s28, %s151_s28 }
  0x26   : > { %p610_p6 = scmp.lt.s32.totalorder %s608_s17, %s601_s12 }
  0x27   : > { %p604_p13 = pnand %p602_p1, %p588_p5 }
  0x28   : > { %p611_p2 = por %p610_p6, %p609_p12 }
  0x29   : > { %p605_p0 = pneg %p604_p13 }
  0x2b   : > { %p612_p3 = pnand %p611_p2, %p605_p0 }
  0x2d   : > { %615 = shalt.err (!%p612_p3)
}
  0x2e   : > { %s754_s18 = smov 128   ;;  %s755_s20 = smov 8  }
  0x2f   : > { %p996_p7 = scmp.ne.s32.totalorder %s995_s29, 0  ;;  %p478_p8 = scmp.ge.s32.totalorder %s751_s16, 1 }
  0x30   : > { %p158_p9 = scmp.lt.s32.totalorder %s751_s16, 3 }
  0x31   : > { %500 = dma.hbm_to_vmem [thread:$0]  (!%p996_p7), %s985_s0, 256, %s151_s28, [#allocation5], %s754_s18, %s754_s18, %s755_s20  }
  0x32   : > { %p159_p5 = pnand %p478_p8, %p158_p9 }
  0x33   : > { %s164_s27 = sand.u32 (!%p159_p5), 1, %s739_s13   ;;  %p997_p6 = scmp.ne.s32.totalorder (!%p159_p5), %s992_s21, 0 }
  0x34   : > { %162 = sbr.rel (%p159_p5) target bundleno = 578 (0x242), region = 24  ;;  %s479_s30 = sshll.u32 (!%p159_p5), %s164_s27, 4 }
  0x35   : > { %s165_s3 = scalar_lea.sflag (!%p159_p5), [#allocation5], %s164_s27  ;;  %s874_s4 = scalar_lea.vmem (!%p159_p5), [#allocation4], %s479_s30 }
  0x3b   : > { %709 = dma.done.wait (%p997_p6), %s165_s3, 256  }
  0x3c   : > { %711 = vsyncadd (%p997_p6), %s165_s3, 4294967040  ;;  %s881_s29 = sand.u32 1, %s727_s10   ;;  %v756_v0 = vmov -inf   ;;  %v757_v1 = vmov 0   ;;  %p482_p12 = scmp.ge.s32.totalorder %s743_s14, 0 }
  0x3d   : > { %s480_s28 = sshll.u32 %s881_s29, 3  ;;  %203 = vst [vmem:[#allocation2] sm:$0xff] %v756_v0  ;;  %204 = vst [vmem:[#allocation2 + $0x8] sm:$0xff] %v756_v0  ;;  %v211_v2 = vld [vmem:[%s874_s4] sm:$0xff] (!%p482_p12)  ;;  %v219_v5 = vstv (!%p482_p12), %s743_s14  ;;  %v212_v6 = vld [vmem:[%s874_s4 + $0x8] sm:$0xff] (!%p482_p12) }
  0x3e   : > { %205 = vst [vmem:[#allocation3] sm:$0xff] %v757_v1  ;;  %206 = vst [vmem:[#allocation3 + $0x8] sm:$0xff] %v757_v1  ;;  %s884_s5 = scalar_lea.vmem [#allocation7], %s480_s28  ;;  %s886_s6 = scalar_lea.vmem [#allocation8], %s480_s28 }
  0x3f   : > { %210 = sbr.rel (%p482_p12) target bundleno = 73 (0x49), region = 36 }
  0x44   : > { %v213_v3 = vld [vmem:[#allocation2] sm:$0xff] (!%p482_p12)  ;;  %v214_v7 = vld [vmem:[#allocation2 + $0x8] sm:$0xff] (!%p482_p12) }
  0x45   : > { %v217_v4 = vld [vmem:[#allocation3] sm:$0xff] (!%p482_p12)  ;;  %vm215_vm0 = vcmp.gt.f32.partialorder (!%p482_p12), %v211_v2, %v213_v3  ;;  %v218_v8 = vld [vmem:[#allocation3 + $0x8] sm:$0xff] (!%p482_p12)  ;;  %vm216_vm1 = vcmp.gt.f32.partialorder (!%p482_p12), %v212_v6, %v214_v7 }
  0x46   : > { %v220_v9 = vsel %vm215_vm0, %v219_v5, %v217_v4  ;;  %v226_v10 = vsel %vm215_vm0, %v211_v2, %v213_v3  ;;  %v221_v11 = vsel %vm216_vm1, %v219_v5, %v218_v8  ;;  %v227_v12 = vsel %vm216_vm1, %v212_v6, %v214_v7 }
  0x47   : > { %222 = vst [vmem:[#allocation3] sm:$0xff] %v220_v9  ;;  %228 = vst [vmem:[#allocation2] sm:$0xff] %v226_v10 }
  0x48   : > { %223 = vst [vmem:[#allocation3 + $0x8] sm:$0xff] %v221_v11  ;;  %229 = vst [vmem:[#allocation2 + $0x8] sm:$0xff] %v227_v12 }
  0x49 PF: > { %p483_p13 = scmp.ne.s32.totalorder %s743_s14, 0 }
  0x4a   : > { %v234_v13 = vld [vmem:[%s874_s4] sm:$0xff] (!%p483_p13)  ;;  %v242_v16 = vstv (!%p483_p13), %s743_s14  ;;  %v235_v17 = vld [vmem:[%s874_s4 + $0x8] sm:$0xff] (!%p483_p13) }
  0x4b   : > { %233 = sbr.rel (%p483_p13) target bundleno = 83 (0x53), region = 40 }
  0x4e   : > { %v236_v14 = vld [vmem:[#allocation2] sm:$0xff] (!%p483_p13)  ;;  %v240_v15 = vld [vmem:[#allocation3] sm:$0xff] (!%p483_p13) }
  0x4f   : > { %vm238_vm2 = vcmp.gt.f32.partialorder (!%p483_p13), %v234_v13, %v236_v14  ;;  %v237_v18 = vld [vmem:[#allocation2 + $0x8] sm:$0xff] (!%p483_p13)  ;;  %v241_v19 = vld [vmem:[#allocation3 + $0x8] sm:$0xff] (!%p483_p13) }
  0x50   : > { %v243_v20 = vsel (!%p483_p13), %vm238_vm2, %v242_v16, %v240_v15  ;;  %vm239_vm3 = vcmp.gt.f32.partialorder (!%p483_p13), %v235_v17, %v237_v18  ;;  %v249_v21 = vsel (!%p483_p13), %vm238_vm2, %v234_v13, %v236_v14 }
  0x51   : > { %245 = vst [vmem:[#allocation3] sm:$0xff] (!%p483_p13), %v243_v20  ;;  %v244_v22 = vsel (!%p483_p13), %vm239_vm3, %v242_v16, %v241_v19  ;;  %251 = vst [vmem:[#allocation2] sm:$0xff] (!%p483_p13), %v249_v21  ;;  %v250_v23 = vsel (!%p483_p13), %vm239_vm3, %v235_v17, %v237_v18 }
  0x52   : > { %246 = vst [vmem:[#allocation3 + $0x8] sm:$0xff] %v244_v22  ;;  %252 = vst [vmem:[#allocation2 + $0x8] sm:$0xff] %v250_v23 }
  0x53 PF: > { %v269_v26 = vlaneseq  ;;  %s486_s21 = sshll.u32 %s743_s14, 7  ;;  %s361_s17 = sshll.u32 %s886_s6, 4  ;;  %s362_s17 = int_to_ptr.vmem [resolvable:$true] %s361_s17 }
  0x54   : > { %s903_s12 = scalar_lea.hbm %s987_s2, %s486_s21  ;;  %s335_s18 = scalar_lea.sflag [#allocation9], %s881_s29 }
  0x55   : > { %v270_v28 = vshrl.u32 %v269_v26, 7  ;;  %v273_v41 = vand.u32 127, %v269_v26  ;;  %s616_s20 = scalar_lea.vmem %s362_s17, 128  ;;  %p998_p2 = scmp.ne.s32.totalorder %s993_s25, 0 }
  0x56   : > { %p617_p0 = scmp.ne.s32.totalorder %s362_s17, %s616_s20  ;;  %s758_s22 = smov [#allocation8]  }
  0x57   : > { %v271_v31 = vadd.s32 8, %v270_v28  ;;  %v278_v36 = vmul.u32 128, %v270_v28  ;;  %s620_s23 = sshll.u32 %s758_s22, 4  ;;  %s621_s23 = int_to_ptr.vmem [resolvable:$false] %s620_s23 }
  0x58   : > { %p618_p4 = pnand %p617_p0, %p998_p2  ;;  %s622_s27 = scalar_lea.vmem %s621_s23, 256 }
  0x59   : > { %v256_v24 = vld [vmem:[#allocation2] sm:$0xff]  ;;  %v257_v25 = vld [vmem:[#allocation2 + $0x8] sm:$0xff]  ;;  %v274_v30 = vld [vmem:[#allocation3] sm:$0xff]  ;;  %v279_v38 = vmul.u32 128, %v271_v31  ;;  %p623_p11 = scmp.lt.s32.totalorder %s362_s17, %s621_s23  ;;  %p624_p1 = scmp.lt.s32.totalorder %s622_s27, %s616_s20 }
  0x5a   : > { %258 = vmax.xlane.f32.xlu0 %v256_v24  ;;  %v275_v33 = vld [vmem:[#allocation3 + $0x8] sm:$0xff]  ;;  %v276_v35 = vmul.u32 2048, %v274_v30  ;;  %p619_p10 = pneg %p618_p4 }
  0x5b   : > { %v277_v37 = vmul.u32 2048, %v275_v33  ;;  %p625_p3 = por %p624_p1, %p623_p11 }
  0x5c   : > { %v280_v42 = vadd.s32 %v278_v36, %v276_v35 }
  0x5d   : > { %v281_v43 = vadd.s32 %v279_v38, %v277_v37  ;;  %p626_p7 = pnand %p625_p3, %p619_p10 }
  0x5e   : > { %260 = vmax.xlane.f32.xlu0 %v257_v25  ;;  %v282_v46 = vadd.s32 %v280_v42, %v273_v41 }
  0x5f   : > { %v283_v47 = vadd.s32 %v281_v43, %v273_v41 }
  0xe7   : > { %v259_v27 = vpop.xlane.xlu0 %258 }
  0xeb   : > { %v261_v29 = vpop.xlane.xlu0 %260 }
  0xec   : > { %v262_v32 = vmax.f32 %v259_v27, %v261_v29 }
  0xee   : > { %v263_v34 = vrot.slane %v262_v32, 4 }
  0xf0   : > { %v264_v39 = vmax.f32 %v262_v32, %v263_v34 }
  0xf2   : > { %v265_v40 = vrot.slane %v264_v39, 2 }
  0xf4   : > { %v266_v44 = vmax.f32 %v264_v39, %v265_v40 }
  0xf6   : > { %v267_v45 = vrot.slane %v266_v44, 1 }
  0xf8   : > { %v268_v48 = vmax.f32 %v266_v44, %v267_v45 }
  0xfa   : > { %328 = vst [vmem:[%s886_s6] sm:$0xff] %v268_v48  ;;  %vm284_vm4 = vcmp.eq.f32.partialorder %v256_v24, %v268_v48  ;;  %vm285_vm5 = vcmp.eq.f32.partialorder %v257_v25, %v268_v48 }
  0xfb   : > { %v286_v49 = vsel %vm284_vm4, %v282_v46, 2147483647  ;;  %v287_v50 = vsel %vm285_vm5, %v283_v47, 2147483647 }
  0xfc   : > { %v289_v51 = vshra.s32 %v286_v49, 16  ;;  %v303_v53 = vshra.s32 %v287_v50, 16  ;;  %v288_v55 = vand.u32 65535, %v286_v49  ;;  %v302_v58 = vand.u32 65535, %v287_v50 }
  0xfe   : > { %v291_v52 = vcvt.s32.f32 %v289_v51  ;;  %v305_v54 = vcvt.s32.f32 %v303_v53  ;;  %v290_v57 = vcvt.s32.f32 %v288_v55  ;;  %v304_v61 = vcvt.s32.f32 %v302_v58 }
 0x100   : > { %292 = vmin.xlane.f32.xlu1 %v291_v52 }
 0x104   : > { %306 = vmin.xlane.f32.xlu1 %v305_v54 }
 0x18d   : > { %v293_v56 = vpop.xlane.xlu1 %292 }
 0x18e   : > { %vm294_vm6 = vcmp.eq.f32.partialorder %v291_v52, %v293_v56 }
 0x18f   : > { %v295_v59 = vsel %vm294_vm6, %v290_v57, inf }
 0x190   : > { %296 = vmin.xlane.f32.xlu0 %v295_v59 }
 0x191   : > { %v307_v60 = vpop.xlane.xlu1 %306 }
 0x192   : > { %vm308_vm7 = vcmp.eq.f32.partialorder %v305_v54, %v307_v60 }
 0x193   : > { %v309_v62 = vsel %vm308_vm7, %v304_v61, inf }
 0x194   : > { %310 = vmin.xlane.f32.xlu1 %v309_v62 }
 0x195   : > { %629 = shalt.err (!%p626_p7)
}
 0x196   : > { %s630_s30 = scalar_lea.hbm %s903_s12, 128  ;;  %s634_s28 = scalar_lea.hbm %s987_s2, 256 }
 0x197   : > { %p631_p8 = scmp.ne.s32.totalorder %s903_s12, %s630_s30  ;;  %p635_p6 = scmp.lt.u32.totalorder %s903_s12, %s987_s2 }
 0x198   : > { %p636_p12 = scmp.lt.u32.totalorder %s634_s28, %s630_s30  ;;  %p638_p0 = scmp.lt.u32.totalorder %s630_s30, %s903_s12 }
 0x199   : > { %p632_p9 = pnand %p631_p8, %p998_p2 }
 0x19a   : > { %p637_p13 = por %p636_p12, %p635_p6 }
 0x19b   : > { %p633_p5 = pneg %p632_p9 }
 0x19c   : > { %p639_p4 = por %p638_p0, %p637_p13 }
 0x19e   : > { %p640_p10 = pnand %p639_p4, %p633_p5 }
 0x1a0   : > { %643 = shalt.err (!%p640_p10)
}
 0x1a1   : > { %494 = dma.vmem_to_hbm [thread:$0]  (%p998_p2), %s362_s17, 128, %s903_s12, %s335_s18   ;;  %v299_v0 = vcvt.f32.s32 %v293_v56  ;;  %v313_v1 = vcvt.f32.s32 %v307_v60 }
 0x1a2   : > { %s348_s8 = sshll.u32 %s884_s5, 4  ;;  %s930_s18 = scalar_lea.hbm %s986_s1, %s486_s21  ;;  %s932_s8 = int_to_ptr.vmem [resolvable:$true] %s348_s8 }
 0x1a3   : > { %v300_v4 = vshll.u32 %v299_v0, 16  ;;  %v314_v5 = vshll.u32 %v313_v1, 16  ;;  %s330_s20 = scalar_lea.sflag [#allocation6], %s881_s29  ;;  %s644_s22 = scalar_lea.vmem %s932_s8, 128 }
 0x1a4   : > { %p645_p11 = scmp.ne.s32.totalorder %s932_s8, %s644_s22  ;;  %s759_s23 = smov [#allocation7]  }
 0x1a5   : > { %s648_s14 = sshll.u32 %s759_s23, 4  ;;  %s649_s14 = int_to_ptr.vmem [resolvable:$false] %s648_s14 }
 0x1a6   : > { %p646_p1 = pnand %p645_p11, %p998_p2  ;;  %s650_s27 = scalar_lea.vmem %s649_s14, 256 }
 0x1a7   : > { %p651_p7 = scmp.lt.s32.totalorder %s932_s8, %s649_s14  ;;  %p652_p8 = scmp.lt.s32.totalorder %s650_s27, %s644_s22 }
 0x1a8   : > { %p647_p3 = pneg %p646_p1 }
 0x1a9   : > { %p653_p9 = por %p652_p8, %p651_p7 }
 0x1ab   : > { %p654_p5 = pnand %p653_p9, %p647_p3 }
 0x21d   : > { %v297_v63 = vpop.xlane.xlu0 %296 }
 0x21e   : > { %v298_v2 = vcvt.f32.s32 %v297_v63 }
 0x220   : > { %v301_v7 = vadd.s32 %v300_v4, %v298_v2 }
 0x221   : > { %v311_v3 = vpop.xlane.xlu1 %310 }
 0x222   : > { %v312_v6 = vcvt.f32.s32 %v311_v3 }
 0x224   : > { %v315_v8 = vadd.s32 %v314_v5, %v312_v6 }
 0x226   : > { %vm316_vm8 = vcmp.lt.s32.totalorder %v301_v7, %v315_v8 }
 0x227   : > { %v317_v9 = vsel %vm316_vm8, %v301_v7, %v315_v8 }
 0x228   : > { %v318_v10 = vrot.slane %v317_v9, 4 }
 0x22a   : > { %vm319_vm9 = vcmp.lt.s32.totalorder %v317_v9, %v318_v10 }
 0x22b   : > { %v320_v11 = vsel %vm319_vm9, %v317_v9, %v318_v10 }
 0x22c   : > { %v321_v12 = vrot.slane %v320_v11, 2 }
 0x22e   : > { %vm322_vm10 = vcmp.lt.s32.totalorder %v320_v11, %v321_v12 }
 0x22f   : > { %v323_v13 = vsel %vm322_vm10, %v320_v11, %v321_v12 }
 0x230   : > { %v324_v14 = vrot.slane %v323_v13, 1 }
 0x232   : > { %vm325_vm11 = vcmp.lt.s32.totalorder %v323_v13, %v324_v14 }
 0x233   : > { %v326_v15 = vsel %vm325_vm11, %v323_v13, %v324_v14 }
 0x234   : > { %327 = vst [vmem:[%s884_s5] sm:$0xff] %v326_v15 }
 0x235   : > { %657 = shalt.err (!%p654_p5)
}
 0x236   : > { %s658_s29 = scalar_lea.hbm %s930_s18, 128  ;;  %s662_s30 = scalar_lea.hbm %s986_s1, 256 }
 0x237   : > { %p659_p6 = scmp.ne.s32.totalorder %s930_s18, %s658_s29  ;;  %p663_p0 = scmp.lt.u32.totalorder %s930_s18, %s986_s1 }
 0x238   : > { %p664_p4 = scmp.lt.u32.totalorder %s662_s30, %s658_s29  ;;  %p666_p11 = scmp.lt.u32.totalorder %s658_s29, %s930_s18 }
 0x239   : > { %p660_p12 = pnand %p659_p6, %p998_p2 }
 0x23a   : > { %p665_p10 = por %p664_p4, %p663_p0 }
 0x23b   : > { %p661_p13 = pneg %p660_p12 }
 0x23c   : > { %p667_p1 = por %p666_p11, %p665_p10 }
 0x23e   : > { %p668_p3 = pnand %p667_p1, %p661_p13 }
 0x240   : > { %671 = shalt.err (!%p668_p3)
}
 0x241   : > { %493 = dma.vmem_to_hbm [thread:$0]  (%p998_p2), %s932_s8, 128, %s930_s18, %s330_s20  }
 0x242 PF: > { %s373_s28 = sand.u32 1, %s723_s9   ;;  %p999_p7 = scmp.ne.s32.totalorder %s994_s26, 0 }
 0x243   : > { %p1000_p8 = scmp.ge.s32.totalorder %s751_s16, 2  ;;  %s374_s6 = scalar_lea.sflag [#allocation6], %s373_s28 }
 0x245   : > { %p502_p9 = pnand %p1000_p8, %p999_p7 }
 0x247   : > { %713 = dma.done.wait (!%p502_p9), %s374_s6, 128  }
 0x248   : > { %715 = vsyncadd (!%p502_p9), %s374_s6, 4294967168  ;;  %s383_s7 = scalar_lea.sflag [#allocation9], %s373_s28 }
 0x249   : > { %717 = dma.done.wait (!%p502_p9), %s383_s7, 128  }
 0x24a   : > { %719 = vsyncadd (!%p502_p9), %s383_s7, 4294967168  ;;  %s22_s16 = sadd.s32 1, %s751_s16   ;;  %s1001_s9 = smov %s727_s10 }
 0x24b   : > { %p19_p5 = scmp.ge.s32.totalorder %s22_s16, 4   ;;  %s1002_s10 = smov %s731_s11 }
 0x24c   : > { %s1003_s11 = smov %s833_s24  ;;  %s1004_s12 = smov %s739_s13 }
 0x24d   : > { %s975_s13 = smov 0   ;;  %s1005_s14 = smov %s747_s15 }
 0x24e   : > { %s1006_s15 = smov %s1008_s19  ;;  %21 = sbr.rel (!%p19_p5) target bundleno = 9 (0x9), region = 102 }
 0x255   :  { %388 = vsyncpa [#allocation5], 1 }
 0x256   :  { %390 = vsyncpa [#allocation5 + $0x1], 1 }
 0x257   :  { %391 = vsyncpa [#allocation6], 1 }
 0x258   :  { %393 = vsyncpa [#allocation6 + $0x1], 1 }
 0x259   :  { %394 = vsyncpa [#allocation9], 1 }
 0x25a   :  { %396 = vsyncpa [#allocation9 + $0x1], 1 }

</bundles_post_ra>
